<compile_context>
chip_gen: v6e
topology: v6e:2x2x1
jax: 0.10.0
libtpu: 0.0.40
codegen_flags: <defaults>
</compile_context>

<pallas_src>
import functools
import math

import jax
import jax.numpy as jnp
from jax.experimental import pallas as pl
from jax.experimental.pallas import tpu as pltpu

F32 = jnp.float32
BF16 = jnp.bfloat16
VMEM_SPEC = pl.BlockSpec(memory_space=pltpu.MemorySpace.VMEM)

LANE = 128
SUBLANE = 8

_VMEM_LIMIT = None


def _vmem_limit_bytes():
    """Per-generation scoped-VMEM limit: ~3/4 of physical, capped at 100 MiB."""
    global _VMEM_LIMIT
    if _VMEM_LIMIT is None:
        try:
            cap = int(pltpu.get_tpu_info().vmem_capacity_bytes)
        except Exception:
            cap = 64 * 1024 * 1024  # conservative default (v7x physical VMEM / TC)
        _VMEM_LIMIT = int(min(cap * 3 // 4, 100 * 1024 * 1024))
    return _VMEM_LIMIT


def _compiler_params(semantics):
    return pltpu.CompilerParams(dimension_semantics=semantics,
                                vmem_limit_bytes=_vmem_limit_bytes())


def _pick_tile(dim, target, align):
    """Largest tile <= target that divides `dim` and is `align`-aligned, else full dim."""
    if dim <= target:
        return dim
    t = (target // align) * align
    while t >= align:
        if dim % t == 0:
            return t
        t -= align
    return dim


def _shrink_tile(dim, tile, est_fn, budget, align):
    """Halve the tile (keeping divisibility) until the VMEM estimate fits the budget."""
    while est_fn(tile) > budget and tile > align:
        new = _pick_tile(dim, max(align, tile // 2), align)
        if new >= tile:
            break
        tile = new
    return tile


# ----------------------------- Pallas kernels ------------------------------

def _gelu(y):  # exact (erf) GELU, as in BERT
    return 0.5 * y * (1.0 + jax.lax.erf(y * 0.7071067811865476))


def _apply_act(y, activation):
    if activation == "tanh":
        return jnp.tanh(y)
    if activation == "gelu":
        return _gelu(y)
    return y


def _linear_resident_kernel(activation, x_ref, w_ref, b_ref, o_ref):
    # Weight fully resident in VMEM (constant index map): single-pass matmul.
    y = jnp.dot(x_ref[...], w_ref[...], preferred_element_type=jnp.float32)
    y = _apply_act(y + b_ref[...], activation)
    o_ref[...] = y.astype(o_ref.dtype)


def _linear_tiled_kernel(activation, x_ref, w_ref, b_ref, o_ref, acc_ref):
    # Fallback for weights too large for VMEM: (M, N, K) grid + f32 accumulator.
    k = pl.program_id(2)

    @pl.when(k == 0)
    def _():
        acc_ref[...] = jnp.zeros_like(acc_ref)

    acc_ref[...] += jnp.dot(x_ref[...], w_ref[...],
                            preferred_element_type=jnp.float32)

    @pl.when(k == pl.num_programs(2) - 1)
    def _():
        y = _apply_act(acc_ref[...] + b_ref[...], activation)
        o_ref[...] = y.astype(o_ref.dtype)


def linear(x, w_t, b, activation="none", out_dtype=None, tm_target=256):
    """y = act(x @ w_t + b); w_t pre-transposed to [in, out]."""
    M, K = x.shape
    Kw, N = w_t.shape
    assert K == Kw
    out_dtype = out_dtype or x.dtype
    budget = int(_vmem_limit_bytes() * 0.7)
    in_sz = jnp.dtype(x.dtype).itemsize
    out_sz = jnp.dtype(out_dtype).itemsize
    w_bytes = K * N * jnp.dtype(w_t.dtype).itemsize

    if w_bytes <= budget // 2:
        # Weight-resident path: weight DMA'd once; grid over M only.
        def est(tm):
            return (w_bytes + 2 * tm * K * in_sz + 2 * tm * N * out_sz
                    + tm * N * 4 + 8 * N)

        tm = _shrink_tile(M, _pick_tile(M, tm_target, SUBLANE), est, budget, SUBLANE)
        kern = functools.partial(_linear_resident_kernel, activation)
        return pl.pallas_call(
            kern,
            out_shape=jax.ShapeDtypeStruct((M, N), out_dtype),
            grid_spec=pltpu.PrefetchScalarGridSpec(
                num_scalar_prefetch=0,
                grid=(M // tm,),
                in_specs=[
                    pl.BlockSpec((tm, K), lambda i: (i, 0)),
                    pl.BlockSpec((K, N), lambda i: (0, 0)),   # resident weight
                    pl.BlockSpec((1, N), lambda i: (0, 0)),
                ],
                out_specs=pl.BlockSpec((tm, N), lambda i: (i, 0)),
            ),
            compiler_params=_compiler_params(("parallel",)),
        )(x, w_t, b)

    # Tiled fallback (weight streamed over N/K grid axes).
    tm = _pick_tile(M, tm_target, SUBLANE)
    tn = _pick_tile(N, 256, LANE)
    tk = _pick_tile(K, 512, LANE)
    kern = functools.partial(_linear_tiled_kernel, activation)
    return pl.pallas_call(
        kern,
        out_shape=jax.ShapeDtypeStruct((M, N), out_dtype),
        grid_spec=pltpu.PrefetchScalarGridSpec(
            num_scalar_prefetch=0,
            grid=(M // tm, N // tn, K // tk),
            in_specs=[
                pl.BlockSpec((tm, tk), lambda i, j, k: (i, k)),
                pl.BlockSpec((tk, tn), lambda i, j, k: (k, j)),
                pl.BlockSpec((1, tn), lambda i, j, k: (0, j)),
            ],
            out_specs=pl.BlockSpec((tm, tn), lambda i, j, k: (i, j)),
            scratch_shapes=[pltpu.VMEM((tm, tn), jnp.float32)],
        ),
        compiler_params=_compiler_params(("parallel", "parallel", "arbitrary")),
    )(x, w_t, b)


def _linear_res_ln_kernel(eps, x_ref, w_ref, b_ref, r_ref, g_ref, bt_ref, o_ref):
    # y = LayerNorm(x @ W + b + residual); weight resident, full row per block.
    y = jnp.dot(x_ref[...], w_ref[...], preferred_element_type=jnp.float32)
    y = y + b_ref[...] + r_ref[...].astype(jnp.float32)
    mu = jnp.mean(y, axis=-1, keepdims=True)
    var = jnp.mean(jnp.square(y - mu), axis=-1, keepdims=True)
    y = (y - mu) * jax.lax.rsqrt(var + eps) * g_ref[...] + bt_ref[...]
    o_ref[...] = y.astype(o_ref.dtype)


def linear_residual_layernorm(x, w_t, b, residual, gamma, beta, eps=1e-12,
                              out_dtype=None, tm_target=256):
    M, K = x.shape
    Kw, N = w_t.shape
    assert K == Kw
    out_dtype = out_dtype or residual.dtype
    budget = int(_vmem_limit_bytes() * 0.7)
    in_sz = jnp.dtype(x.dtype).itemsize
    out_sz = jnp.dtype(out_dtype).itemsize
    r_sz = jnp.dtype(residual.dtype).itemsize
    w_bytes = K * N * jnp.dtype(w_t.dtype).itemsize
    # TODO(synk): weights larger than the VMEM budget would need a K-split grid here;
    # all BERT projection weights (<= ~10 MB bf16) fit comfortably.

    def est(tm):
        return (w_bytes + 2 * tm * K * in_sz + 2 * tm * N * r_sz
                + 2 * tm * N * out_sz + tm * N * 4 + 16 * N)

    tm = _shrink_tile(M, _pick_tile(M, tm_target, SUBLANE), est, budget, SUBLANE)
    kern = functools.partial(_linear_res_ln_kernel, eps)
    return pl.pallas_call(
        kern,
        out_shape=jax.ShapeDtypeStruct((M, N), out_dtype),
        grid_spec=pltpu.PrefetchScalarGridSpec(
            num_scalar_prefetch=0,
            grid=(M // tm,),
            in_specs=[
                pl.BlockSpec((tm, K), lambda i: (i, 0)),
                pl.BlockSpec((K, N), lambda i: (0, 0)),   # resident weight
                pl.BlockSpec((1, N), lambda i: (0, 0)),
                pl.BlockSpec((tm, N), lambda i: (i, 0)),
                pl.BlockSpec((1, N), lambda i: (0, 0)),
                pl.BlockSpec((1, N), lambda i: (0, 0)),
            ],
            out_specs=pl.BlockSpec((tm, N), lambda i: (i, 0)),
        ),
        compiler_params=_compiler_params(("parallel",)),
    )(x, w_t, b, residual, gamma, beta)


def _layernorm_kernel(eps, x_ref, g_ref, b_ref, o_ref):
    x = x_ref[...].astype(jnp.float32)
    mu = jnp.mean(x, axis=-1, keepdims=True)
    var = jnp.mean(jnp.square(x - mu), axis=-1, keepdims=True)
    y = (x - mu) * jax.lax.rsqrt(var + eps) * g_ref[...] + b_ref[...]
    o_ref[...] = y.astype(o_ref.dtype)


def layernorm(x, gamma, beta, eps=1e-12, out_dtype=None, tm_target=512):
    M, N = x.shape
    out_dtype = out_dtype or x.dtype
    tm = _pick_tile(M, tm_target, SUBLANE)
    kern = functools.partial(_layernorm_kernel, eps)
    return pl.pallas_call(
        kern,
        out_shape=jax.ShapeDtypeStruct((M, N), out_dtype),
        grid_spec=pltpu.PrefetchScalarGridSpec(
            num_scalar_prefetch=0,
            grid=(M // tm,),
            in_specs=[
                pl.BlockSpec((tm, N), lambda i: (i, 0)),
                pl.BlockSpec((1, N), lambda i: (0, 0)),
                pl.BlockSpec((1, N), lambda i: (0, 0)),
            ],
            out_specs=pl.BlockSpec((tm, N), lambda i: (i, 0)),
        ),
        compiler_params=_compiler_params(("parallel",)),
    )(x, gamma, beta)


def _attn_block_kernel(nh, eps, xq_ref, xkv_ref, mask_ref,
                       wq_ref, bq_ref, wk_ref, bk_ref, wv_ref, bv_ref,
                       wo_ref, bo_ref, g_ref, beta_ref, o_ref):
    """Fused QKV projection + MHA + output projection + residual + LayerNorm.

    xq: (tq, H) query rows; xkv: (S, H) full sequence of the current batch element;
    per-head weights wq/wk/wv: (nh, H, hd), wo: (nh, hd, H); mask: (1, S) additive f32.
    """
    xq = xq_ref[...]
    xkv = xkv_ref[...]
    mask = mask_ref[...]                                   # (1, S), f32
    cdt = xq.dtype
    acc = xq.astype(jnp.float32) + bo_ref[...]             # residual + output-proj bias
    for h in range(nh):
        # Per-head projections (LoRA and 1/sqrt(hd) already folded into wq/bq).
        q = (jnp.dot(xq, wq_ref[h], preferred_element_type=jnp.float32)
             + bq_ref[h]).astype(cdt)                      # (tq, hd)
        k = (jnp.dot(xkv, wk_ref[h], preferred_element_type=jnp.float32)
             + bk_ref[h]).astype(cdt)                      # (S, hd)
        v = (jnp.dot(xkv, wv_ref[h], preferred_element_type=jnp.float32)
             + bv_ref[h]).astype(cdt)                      # (S, hd)
        s = jax.lax.dot_general(q, k, (((1,), (1,)), ((), ())),
                                preferred_element_type=jnp.float32)  # (tq, S)
        s = s + mask                                       # mask + softmax in f32
        s = s - jnp.max(s, axis=-1, keepdims=True)
        p = jnp.exp(s)
        denom = jnp.sum(p, axis=-1, keepdims=True)
        ctx = jnp.dot(p.astype(cdt), v, preferred_element_type=jnp.float32)  # (tq, hd)
        # Normalize after PV: hd-wide multiply instead of S-wide; approx recip -> EUP.
        ctx = ctx * pl.reciprocal(denom, approx=True)
        acc = acc + jnp.dot(ctx.astype(cdt), wo_ref[h],
                            preferred_element_type=jnp.float32)              # (tq, H)
    mu = jnp.mean(acc, axis=-1, keepdims=True)
    var = jnp.mean(jnp.square(acc - mu), axis=-1, keepdims=True)
    y = (acc - mu) * jax.lax.rsqrt(var + eps) * g_ref[...] + beta_ref[...]
    o_ref[...] = y.astype(o_ref.dtype)


def attention_block(x2d, mask3, lp, nh, hd, S, eps=1e-12, tq_target=512):
    """x2d: [B*S, H] -> [B*S, H] (attention sub-layer output, lane-dense)."""
    M, H = x2d.shape
    B = M // S
    itemsize = jnp.dtype(x2d.dtype).itemsize
    budget = int(_vmem_limit_bytes() * 0.7)
    w_bytes = 4 * nh * H * hd * jnp.dtype(lp["wq_h"].dtype).itemsize

    def est(tq):
        return (w_bytes
                + 2 * S * H * itemsize        # x_kv double-buffered
                + 4 * tq * H * itemsize       # x_q + output double-buffered
                + 2 * tq * S * 4              # scores / probs (f32)
                + (tq + 2 * S) * hd * 4       # per-head q/k/v (f32)
                + 2 * tq * H * 4)             # accumulator / LN temps (f32)

    tq = _shrink_tile(S, _pick_tile(S, tq_target, SUBLANE), est, budget, SUBLANE)
    nq = S // tq
    kern = functools.partial(_attn_block_kernel, nh, eps)
    return pl.pallas_call(
        kern,
        out_shape=jax.ShapeDtypeStruct((M, H), x2d.dtype),
        grid_spec=pltpu.PrefetchScalarGridSpec(
            num_scalar_prefetch=0,
            grid=(B, nq),
            in_specs=[
                pl.BlockSpec((tq, H), lambda b, i: (b * nq + i, 0)),   # query rows
                pl.BlockSpec((S, H), lambda b, i: (b, 0)),             # full seq (K/V)
                pl.BlockSpec((None, 1, S), lambda b, i: (b, 0, 0)),    # additive mask
                pl.BlockSpec((nh, H, hd), lambda b, i: (0, 0, 0)),     # wq (resident)
                pl.BlockSpec((nh, 1, hd), lambda b, i: (0, 0, 0)),     # bq
                pl.BlockSpec((nh, H, hd), lambda b, i: (0, 0, 0)),     # wk
                pl.BlockSpec((nh, 1, hd), lambda b, i: (0, 0, 0)),     # bk
                pl.BlockSpec((nh, H, hd), lambda b, i: (0, 0, 0)),     # wv
                pl.BlockSpec((nh, 1, hd), lambda b, i: (0, 0, 0)),     # bv
                pl.BlockSpec((nh, hd, H), lambda b, i: (0, 0, 0)),     # wo (resident)
                pl.BlockSpec((1, H), lambda b, i: (0, 0)),             # bo
                pl.BlockSpec((1, H), lambda b, i: (0, 0)),             # ln gamma
                pl.BlockSpec((1, H), lambda b, i: (0, 0)),             # ln beta
            ],
            out_specs=pl.BlockSpec((tq, H), lambda b, i: (b * nq + i, 0)),
        ),
        compiler_params=_compiler_params(("parallel", "parallel")),
    )(x2d, x2d, mask3,
      lp["wq_h"], lp["bq_h"], lp["wk_h"], lp["bk_h"], lp["wv_h"], lp["bv_h"],
      lp["wo_h"], lp["bo"], lp["ln1_g"], lp["ln1_b"])


# Tail heads.
def _pooler_head_kernel(cls_ref, wp_ref, bp_ref, wc_ref, bc_ref, o_ref):
    emb = jnp.tanh(
        jnp.dot(cls_ref[...], wp_ref[...], preferred_element_type=jnp.float32)
        + bp_ref[...])
    logits = jnp.dot(emb.astype(wc_ref.dtype), wc_ref[...],
                     preferred_element_type=jnp.float32) + bc_ref[...]
    o_ref[...] = logits.astype(o_ref.dtype)


def _small_mean_head_kernel(h_ref, wc_ref, bc_ref, o_ref):
    emb = jnp.mean(h_ref[...].astype(jnp.float32), axis=1)          # [B, H]
    logits = jnp.dot(emb.astype(wc_ref.dtype), wc_ref[...],
                     preferred_element_type=jnp.float32) + bc_ref[...]
    o_ref[...] = logits.astype(o_ref.dtype)


def _mean_head_tiled_kernel(inv_s, h_ref, wc_ref, bc_ref, o_ref, acc_ref):
    i = pl.program_id(0)

    @pl.when(i == 0)
    def _():
        acc_ref[...] = jnp.zeros_like(acc_ref)

    acc_ref[...] += jnp.sum(h_ref[...].astype(jnp.float32), axis=1)  # [B, H]

    @pl.when(i == pl.num_programs(0) - 1)
    def _():
        emb = acc_ref[...] * inv_s
        logits = jnp.dot(emb.astype(wc_ref.dtype), wc_ref[...],
                         preferred_element_type=jnp.float32) + bc_ref[...]
        o_ref[...] = logits.astype(o_ref.dtype)


def pooled_mean_head(hidden, cls_w_t, cls_b, num_labels, ts_target=128):
    """mean over S of [B,S,H], then classifier — tiled over S (no full-array load)."""
    B, S, H = hidden.shape
    ts = _pick_tile(S, ts_target, SUBLANE)
    kern = functools.partial(_mean_head_tiled_kernel, 1.0 / S)
    return pl.pallas_call(
        kern,
        out_shape=jax.ShapeDtypeStruct((B, num_labels), F32),
        grid_spec=pltpu.PrefetchScalarGridSpec(
            num_scalar_prefetch=0,
            grid=(S // ts,),
            in_specs=[
                pl.BlockSpec((B, ts, H), lambda i: (0, i, 0)),
                pl.BlockSpec((H, num_labels), lambda i: (0, 0)),
                pl.BlockSpec((1, num_labels), lambda i: (0, 0)),
            ],
            out_specs=pl.BlockSpec((B, num_labels), lambda i: (0, 0)),
            scratch_shapes=[pltpu.VMEM((B, H), jnp.float32)],
        ),
        compiler_params=_compiler_params(("arbitrary",)),
    )(hidden, cls_w_t, cls_b)


# ------------------------------- parameters --------------------------------

def init_params(key, cfg):
    H = cfg["hidden_size"]
    L = cfg["num_layers"]
    I = cfg["intermediate_size"]
    r = cfg["lora_r"]
    ks = iter(jax.random.split(key, 256))

    def nrm(shape, std=0.02):
        return (jax.random.normal(next(ks), shape, F32) * std).astype(F32)

    params = {
        "word_emb": nrm((cfg["vocab_size"], H)),
        "pos_emb": nrm((cfg["max_position"], H)),
        "type_emb": nrm((2, H)),
        "emb_ln_g": jnp.ones((H,), F32),
        "emb_ln_b": jnp.zeros((H,), F32),
        "pooler_w": nrm((H, H)),
        "pooler_b": jnp.zeros((H,), F32),
        "cls_w": nrm((cfg["num_labels"], H)),
        "cls_b": jnp.zeros((cfg["num_labels"],), F32),
        "layers": [],
    }
    for _ in range(L):
        params["layers"].append({
            "wq": nrm((H, H)), "bq": jnp.zeros((H,), F32),
            "wk": nrm((H, H)), "bk": jnp.zeros((H,), F32),
            "wv": nrm((H, H)), "bv": jnp.zeros((H,), F32),
            "wo": nrm((H, H)), "bo": jnp.zeros((H,), F32),
            # LoRA adapters on query & value (PEFT default target modules).
            "aq": nrm((r, H)), "bq_lora": nrm((H, r), 0.01),
            "av": nrm((r, H)), "bv_lora": nrm((H, r), 0.01),
            "w1": nrm((I, H)), "b1": jnp.zeros((I,), F32),
            "w2": nrm((H, I)), "b2": jnp.zeros((H,), F32),
            "ln1_g": jnp.ones((H,), F32), "ln1_b": jnp.zeros((H,), F32),
            "ln2_g": jnp.ones((H,), F32), "ln2_b": jnp.zeros((H,), F32),
        })
    return params


def prepare_params(params, cfg, compute_dtype=BF16):
    """Fold LoRA + attention scale into base weights, build per-head weight slabs,
    pre-transpose all linears to [in, out], cast matmul weights to bf16."""
    H = cfg["hidden_size"]
    nh = cfg["num_heads"]
    hd = H // nh
    lora_scale = cfg["lora_alpha"] / cfg["lora_r"]
    attn_scale = 1.0 / math.sqrt(hd)

    def wt(w):  # torch [out, in] -> [in, out]
        return jnp.asarray(w.T, dtype=compute_dtype)

    def row(b):  # bias / LN params kept in f32, shaped [1, N]
        return jnp.asarray(b, F32).reshape(1, -1)

    def heads_in(w):   # torch [out=H, in=H] -> [nh, H(in), hd] (split output dim)
        return jnp.asarray(w.T.reshape(H, nh, hd).transpose(1, 0, 2),
                           dtype=compute_dtype)

    def heads_out(w):  # torch [out=H, in=H] -> [nh, hd, H(out)] (split input dim)
        return jnp.asarray(w.T.reshape(nh, hd, H), dtype=compute_dtype)

    def head_bias(b, scale=1.0):
        return (jnp.asarray(b, F32) * scale).reshape(nh, 1, hd)

    prepped = {
        "word_emb": params["word_emb"],
        "pos_emb": params["pos_emb"],
        "type_emb": params["type_emb"],
        "emb_ln_g": row(params["emb_ln_g"]),
        "emb_ln_b": row(params["emb_ln_b"]),
        "pooler_w_t": wt(params["pooler_w"]),
        "pooler_b": row(params["pooler_b"]),
        "cls_w_t": wt(params["cls_w"]),
        "cls_b": row(params["cls_b"]),
        "layers": [],
    }
    for lp in params["layers"]:
        # lora_dropout is an inference-time no-op; LoRA is folded:
        # y = x W^T + b + scale * x A^T B^T  ==  x (W + scale * B A)^T + b
        wq_eff = lp["wq"] + lora_scale * (lp["bq_lora"] @ lp["aq"])
        wv_eff = lp["wv"] + lora_scale * (lp["bv_lora"] @ lp["av"])
        # NOTE: 1/sqrt(hd) is folded into wq/bq (bf16 rounding of the scaled
        # weight; acceptable for bf16 inference).
        prepped["layers"].append({
            "wq_h": heads_in(attn_scale * wq_eff), "bq_h": head_bias(lp["bq"], attn_scale),
            "wk_h": heads_in(lp["wk"]), "bk_h": head_bias(lp["bk"]),
            "wv_h": heads_in(wv_eff), "bv_h": head_bias(lp["bv"]),
            "wo_h": heads_out(lp["wo"]), "bo": row(lp["bo"]),
            "ln1_g": row(lp["ln1_g"]), "ln1_b": row(lp["ln1_b"]),
            "w1_t": wt(lp["w1"]), "b1": row(lp["b1"]),
            "w2_t": wt(lp["w2"]), "b2": row(lp["b2"]),
            "ln2_g": row(lp["ln2_g"]), "ln2_b": row(lp["ln2_b"]),
        })
    return prepped


# ------------------------------ forward pass --------------------------------

def bert_forward(prepped, cfg, input_ids, attention_mask, compute_dtype=BF16):
    B, S = input_ids.shape
    H = cfg["hidden_size"]
    nh = cfg["num_heads"]
    hd = H // nh

    # Embedding gathers stay in XLA (glue); LayerNorm runs in Pallas.
    # TODO(synk): token_type_ids fixed to 0 and position_ids to arange(S) (default
    # HF call path, no padding offset).
    x = (prepped["word_emb"][input_ids]
         + prepped["pos_emb"][jnp.arange(S)][None, :, :]
         + prepped["type_emb"][0][None, None, :])
    h2d = layernorm(x.reshape(B * S, H), prepped["emb_ln_g"],
                    prepped["emb_ln_b"], out_dtype=compute_dtype)
    hidden_states = [h2d]                                  # [B*S, H] per layer output

    # Additive mask kept in f32 (bf16 would saturate with -1e9).
    mask3 = ((1.0 - attention_mask.astype(F32)) * -1e9)[:, None, :]   # [B, 1, S]

    for lp in prepped["layers"]:
        h_in = hidden_states[-1]
        # 3 pallas_calls per layer, no XLA transposes:
        h1 = attention_block(h_in, mask3, lp, nh, hd, S)              # attn + res + LN
        ff = linear(h1, lp["w1_t"], lp["b1"], activation="gelu")      # FFN up + GELU
        h2 = linear_residual_layernorm(ff, lp["w2_t"], lp["b2"], h1,
                                       lp["ln2_g"], lp["ln2_b"])      # FFN down + res + LN
        hidden_states.append(h2)

    num_labels = cfg["num_labels"]
    mode = cfg["bert_output"]
    last3 = hidden_states[-1].reshape(B, S, H)
    if mode == "pooler":
        cls = last3[:, 0, :]                               # [B, H]
        logits = pl.pallas_call(
            _pooler_head_kernel,
            out_shape=jax.ShapeDtypeStruct((B, num_labels), F32),
            in_specs=[VMEM_SPEC] * 5,
            out_specs=VMEM_SPEC,
            compiler_params=_compiler_params(None),
        )(cls, prepped["pooler_w_t"], prepped["pooler_b"],
          prepped["cls_w_t"], prepped["cls_b"])
    elif mode == "pooled_mean":
        logits = pooled_mean_head(last3, prepped["cls_w_t"], prepped["cls_b"],
                                  num_labels)
    elif mode == "last_4":
        cls4 = jnp.stack([hidden_states[i].reshape(B, S, H)[:, 0, :]
                          for i in (-4, -3, -2, -1)], axis=1)          # [B, 4, H]
        logits = pl.pallas_call(
            _small_mean_head_kernel,
            out_shape=jax.ShapeDtypeStruct((B, num_labels), F32),
            in_specs=[VMEM_SPEC] * 3,
            out_specs=VMEM_SPEC,
            compiler_params=_compiler_params(None),
        )(cls4, prepped["cls_w_t"], prepped["cls_b"])
    else:
        raise ValueError('bert_output must be one of "pooler", "pooled_mean", "last_4"')

    # (dropout is commented out in the reference module)
    return logits


# ---------------------------------- main ------------------------------------

if __name__ == "__main__":
    cfg = dict(
        model_name="synthetic-mini-bert",
        hidden_size=32, num_labels=3,
        lora_r=4, lora_alpha=8, lora_dropout=0.0, lora_bias="none",
        bert_output="pooler", dropout_prob=0.0,
        vocab_size=64, num_layers=4, num_heads=2,
        intermediate_size=64, max_position=16,
    )

    key = jax.random.PRNGKey(0)
    pkey, ikey = jax.random.split(key)
    raw_params = init_params(pkey, cfg)
    params = prepare_params(raw_params, cfg)

    B, S = 2, 8
    input_ids = jax.random.randint(ikey, (B, S), 0, cfg["vocab_size"], dtype=jnp.int32)
    attention_mask = jnp.ones((B, S), jnp.int32)

    logits = bert_forward(params, cfg, input_ids, attention_mask)
    jax.block_until_ready(logits)
    assert logits.shape == (B, cfg["num_labels"])
    assert logits.dtype == jnp.float32

    # Exercise the other two bert_output modes as well.
    for mode in ("pooled_mean", "last_4"):
        out = bert_forward(params, dict(cfg, bert_output=mode), input_ids, attention_mask)
        jax.block_until_ready(out)
        assert out.shape == (B, cfg["num_labels"])

    print("KERNEL_OK")
</pallas_src>

<mosaic_0001>
module attributes {stable_mosaic.version = 11 : i64} {
  func.func @_layernorm_kernel(%arg0: i32, %arg1: memref<16x32xf32, #tpu.memory_space<vmem>>, %arg2: memref<1x32xf32, #tpu.memory_space<vmem>>, %arg3: memref<1x32xf32, #tpu.memory_space<vmem>>, %arg4: memref<16x32xbf16, #tpu.memory_space<vmem>>) attributes {dimension_semantics = [#tpu.dimension_semantics<parallel>], iteration_bounds = array<i64: 1>, scalar_prefetch = 0 : i64, scratch_operands = 0 : i64, tpu.core_type = #tpu.core_type<tc>, window_params = [{transform_indices = @transform_0, window_bounds = array<i64: 16, 32>}, {pipeline_mode = #tpu.pipeline_mode<synchronous>, transform_indices = @transform_1, window_bounds = array<i64: 1, 32>}, {pipeline_mode = #tpu.pipeline_mode<synchronous>, transform_indices = @transform_2, window_bounds = array<i64: 1, 32>}, {transform_indices = @transform_3, window_bounds = array<i64: 16, 32>}]} {
    %c0 = arith.constant 0 : index
    %c0_0 = arith.constant 0 : index
    %0 = vector.load %arg1[%c0, %c0_0] : memref<16x32xf32, #tpu.memory_space<vmem>>, vector<16x32xf32>
    %cst = arith.constant dense<0.000000e+00> : vector<16xf32>
    %1 = vector.multi_reduction <add>, %0, %cst [1] : vector<16x32xf32> to vector<16xf32>
    %2 = vector.shape_cast %1 : vector<16xf32> to vector<16x1xf32>
    %cst_1 = arith.constant 3.200000e+01 : f32
    %3 = vector.broadcast %cst_1 : f32 to vector<16x1xf32>
    %4 = arith.divf %2, %3 : vector<16x1xf32>
    %5 = vector.broadcast %4 : vector<16x1xf32> to vector<16x32xf32>
    %6 = arith.subf %0, %5 : vector<16x32xf32>
    %7 = arith.mulf %6, %6 : vector<16x32xf32>
    %cst_2 = arith.constant dense<0.000000e+00> : vector<16xf32>
    %8 = vector.multi_reduction <add>, %7, %cst_2 [1] : vector<16x32xf32> to vector<16xf32>
    %9 = vector.shape_cast %8 : vector<16xf32> to vector<16x1xf32>
    %cst_3 = arith.constant 3.200000e+01 : f32
    %10 = vector.broadcast %cst_3 : f32 to vector<16x1xf32>
    %11 = arith.divf %9, %10 : vector<16x1xf32>
    %12 = vector.broadcast %4 : vector<16x1xf32> to vector<16x32xf32>
    %13 = arith.subf %0, %12 : vector<16x32xf32>
    %cst_4 = arith.constant 9.99999996E-13 : f32
    %14 = vector.broadcast %cst_4 : f32 to vector<16x1xf32>
    %15 = arith.addf %11, %14 : vector<16x1xf32>
    %16 = math.rsqrt %15 : vector<16x1xf32>
    %17 = vector.broadcast %16 : vector<16x1xf32> to vector<16x32xf32>
    %18 = arith.mulf %13, %17 : vector<16x32xf32>
    %c0_5 = arith.constant 0 : index
    %c0_6 = arith.constant 0 : index
    %19 = vector.load %arg2[%c0_5, %c0_6] : memref<1x32xf32, #tpu.memory_space<vmem>>, vector<1x32xf32>
    %20 = vector.broadcast %19 : vector<1x32xf32> to vector<16x32xf32>
    %21 = arith.mulf %18, %20 : vector<16x32xf32>
    %c0_7 = arith.constant 0 : index
    %c0_8 = arith.constant 0 : index
    %22 = vector.load %arg3[%c0_7, %c0_8] : memref<1x32xf32, #tpu.memory_space<vmem>>, vector<1x32xf32>
    %23 = vector.broadcast %22 : vector<1x32xf32> to vector<16x32xf32>
    %24 = arith.addf %21, %23 : vector<16x32xf32>
    %25 = arith.truncf %24 : vector<16x32xf32> to vector<16x32xbf16>
    %c0_9 = arith.constant 0 : index
    %c0_10 = arith.constant 0 : index
    %26 = vector.load %arg4[%c0_9, %c0_10] : memref<16x32xbf16, #tpu.memory_space<vmem>>, vector<16x32xbf16>
    tpu.vector_store %arg4[%c0_9, %c0_10], %25 {strides = array<i32>} : memref<16x32xbf16, #tpu.memory_space<vmem>>, vector<16x32xbf16>,
    return
  }
  func.func @transform_0(%arg0: i32) -> (i32, i32) {
    %c0_i32 = arith.constant 0 : i32
    %c0_i32_0 = arith.constant 0 : i32
    return %arg0, %c0_i32 : i32, i32
  }
  func.func @transform_1(%arg0: i32) -> (i32, i32) {
    %c0_i32 = arith.constant 0 : i32
    %c0_i32_0 = arith.constant 0 : i32
    %c0_i32_1 = arith.constant 0 : i32
    return %c0_i32, %c0_i32_0 : i32, i32
  }
  func.func @transform_2(%arg0: i32) -> (i32, i32) {
    %c0_i32 = arith.constant 0 : i32
    %c0_i32_0 = arith.constant 0 : i32
    %c0_i32_1 = arith.constant 0 : i32
    return %c0_i32, %c0_i32_0 : i32, i32
  }
  func.func @transform_3(%arg0: i32) -> (i32, i32) {
    %c0_i32 = arith.constant 0 : i32
    %c0_i32_0 = arith.constant 0 : i32
    return %arg0, %c0_i32 : i32, i32
  }
}

</mosaic_0001>

<bundles_post_ra>
// kernel: tpu_custom_call.1
= control target key start
LH: loop header
LB: loop body
LE: loop exit
PB: predicated region body
PF: predicated region fallthrough
CT: control target
= control target key end

     0   :  { %8 = vsyncpa [#allocation3], 0  ;;  %s207_s0 = inlined_call_operand.hbm [shape: f32[16,32], index: 0, kind: input, shape index: {}]   ;;  %s208_s1 = inlined_call_operand.vmem [shape: f32[1,32], index: 1, kind: input, shape index: {}]   ;;  %s209_s2 = inlined_call_operand.vmem [shape: f32[1,32], index: 2, kind: input, shape index: {}]   ;;  %s210_s3 = inlined_call_operand.hbm [shape: bf16[16,32], index: 3, kind: output, shape index: {}]  }
   0x1   :  { %9 = vsyncpa [#allocation4], 0  ;;  %s165_s12 = smov [#allocation2]  }
   0x2   :  { %s15_s13 = sshll.u32 %s165_s12, 4  ;;  %s16_s13 = int_to_ptr.vmem [resolvable:$true] %s15_s13 }
   0x3   :  { %s129_s14 = scalar_lea.vmem %s16_s13, 256  ;;  %p134_p1 = scmp.lt.s32.totalorder %s16_s13, %s16_s13 }
   0x4   :  { %p130_p0 = scmp.ne.s32.totalorder %s16_s13, %s129_s14  ;;  %p135_p2 = scmp.lt.s32.totalorder %s129_s14, %s129_s14 }
   0x6   :  { %p136_p3 = por %p135_p2, %p134_p1 }
   0x8   :  { %p137_p4 = pnand %p136_p3, %p130_p0 }
   0xa   :  { %140 = shalt.err (!%p137_p4)
}
   0xb   :  { %s166_s15 = smov 128   ;;  %s167_s16 = smov 8  }
   0xc   :  { %21 = dma.hbm_to_vmem [thread:$0]  %s207_s0, 256, %s16_s13, [#allocation3], %s166_s15, %s166_s15, %s167_s16  }
   0xd   :  { %161 = dma.done.wait [#allocation3], 256  }
   0xe   :  { %162 = vsyncadd [#allocation3], 4294967040  ;;  %vm31_vm0 = vcmask 261120   ;;  %v29_v0 = vld [vmem:[#allocation2] sm:$0xff]  ;;  %v30_v1 = vld [vmem:[#allocation2 + $0x8] sm:$0xff]  ;;  %vm85_vm1 = vcmask 257024  }
   0xf   :  { %v32_v2 = vsel %vm31_vm0, %v29_v0, 0.0  ;;  %v35_v3 = vsel %vm31_vm0, %v30_v1, 0.0  ;;  %v105_v21 = vld [vmem:[%s208_s1] ss:$0 sm:$0xff]  ;;  %s168_s22 = smov [#allocation5]  }
  0x10   :  { %33 = vadd.xlane.f32.xlu0 %v32_v2  ;;  %v106_v23 = vld [vmem:[%s209_s2] ss:$0 sm:$0xff]  ;;  %s93_s23 = sshll.u32 %s168_s22, 4  ;;  %s94_s23 = int_to_ptr.vmem [resolvable:$true] %s93_s23 }
  0x11   :  { %s141_s1 = scalar_lea.vmem %s94_s23, 128  ;;  %p146_p6 = scmp.lt.s32.totalorder %s94_s23, %s94_s23 }
  0x12   :  { %p142_p5 = scmp.ne.s32.totalorder %s94_s23, %s141_s1  ;;  %p147_p7 = scmp.lt.s32.totalorder %s141_s1, %s141_s1 }
  0x14   :  { %36 = vadd.xlane.f32.xlu0 %v35_v3  ;;  %p148_p8 = por %p147_p7, %p146_p6 }
  0x16   :  { %p149_p9 = pnand %p148_p8, %p142_p5 }
  0x99   :  { %v34_v4 = vpop.xlane.xlu0 %33 }
  0x9a   :  { %v39_v5 = vmul.f32 0.03125, %v34_v4 }
  0x9c   :  { %v41_v6 = vsub.f32 %v29_v0, %v39_v5 }
  0x9d   :  { %v37_v7 = vpop.xlane.xlu0 %36 }
  0x9e   :  { %v40_v8 = vmul.f32 0.03125, %v37_v7  ;;  %v43_v9 = vmul.f32 %v41_v6, %v41_v6 }
  0xa0   :  { %v42_v10 = vsub.f32 %v30_v1, %v40_v8  ;;  %v45_v11 = vsel %vm31_vm0, %v43_v9, 0.0 }
  0xa1   :  { %46 = vadd.xlane.f32.xlu1 %v45_v11 }
  0xa2   :  { %v44_v12 = vmul.f32 %v42_v10, %v42_v10 }
  0xa4   :  { %v48_v13 = vsel %vm31_vm0, %v44_v12, 0.0 }
  0xa5   :  { %49 = vadd.xlane.f32.xlu1 %v48_v13 }
 0x12a   :  { %v47_v14 = vpop.xlane.xlu1 %46 }
 0x12b   :  { %v51_v15 = vmul.f32 0.03125, %v47_v14 }
 0x12d   :  { %v53_v16 = vadd.f32 1e-12, %v51_v15 }
 0x12e   :  { %v50_v17 = vpop.xlane.xlu1 %49 }
 0x12f   :  { %117 = vrsqrt.f32 %v53_v16  ;;  %v52_v18 = vmul.f32 0.03125, %v50_v17 }
 0x131   :  { %v54_v19 = vadd.f32 1e-12, %v52_v18 }
 0x133   :  { %119 = vrsqrt.f32 %v54_v19 }
 0x13c   :  { %v118_v20 = vpop.eup %117 }
 0x13d   :  { %v57_v22 = vmul.f32 %v118_v20, %v41_v6 }
 0x13f   :  { %v66_v24 = vmul.f32 %v105_v21, %v57_v22 }
 0x140   :  { %v120_v25 = vpop.eup %119 }
 0x141   :  { %v58_v26 = vmul.f32 %v120_v25, %v42_v10  ;;  %v75_v27 = vadd.f32 %v106_v23, %v66_v24 }
 0x143   :  { %v67_v28 = vmul.f32 %v105_v21, %v58_v26  ;;  %v109_v29 = vpack.c.bf16 %v75_v27, %v75_v27 }
 0x145   :  { %v76_v30 = vadd.f32 %v106_v23, %v67_v28  ;;  %86 = vst.msk [vmem:[#allocation5] sm:$0xf] %vm85_vm1, %v109_v29 }
 0x147   :  { %v110_v31 = vpack.c.bf16 %v76_v30, %v76_v30 }
 0x149   :  { %87 = vst.msk [vmem:[#allocation5 + $0x4] sm:$0xf] %vm85_vm1, %v110_v31 }
 0x14a   :  { %152 = shalt.err (!%p149_p9)
}
 0x14b   :  { %s169_s2 = smov 64   ;;  %s170_s24 = smov 4  }
 0x14c   :  { %99 = dma.vmem_to_hbm [thread:$0]  %s94_s23, 128, %s210_s3, [#allocation4], %s169_s2, %s169_s2, %s170_s24  }
 0x14d   :  { %163 = dma.done.wait [#allocation4], 128  }
 0x14e   :  { %164 = vsyncadd [#allocation4], 4294967168 }
 0x14f   :  { %103 = vsyncpa [#allocation3], 1 }
 0x150   :  { %104 = vsyncpa [#allocation4], 1 }

</bundles_post_ra>
